<compile_context>
chip_gen: v7x
topology: tpu7x:2x2x1
jax: 0.10.0
libtpu: 0.0.40
codegen_flags: <defaults>
</compile_context>

<pallas_src>
import jax
import jax.numpy as jnp
import numpy as np
from jax import lax
from jax.experimental import pallas as pl
from jax.experimental.pallas import tpu as pltpu

# ----------------------------- configuration -------------------------------
TF_DIM = 22
MSA_DIM = 49
C_Z = 32
C_M = 24
MAX_REL_IDX = 4
USE_CHAIN_RELATIVE = True
MAX_REL_CHAIN = 2
BP = 2 * MAX_REL_IDX + 2                       # number of relative-position bins
NO_BINS = BP + 1 + 2 * MAX_REL_CHAIN + 2       # = 2k+2 + 1 + 2c+2
F_DIM = 2 * C_Z + C_M                          # fused tf projection width (88)

N_RES = 16
N_CLUST = 3


def _pick_tile(n, cap):
    """Largest divisor of n that is <= cap, preferring multiples of 8."""
    best = None
    for t in range(min(n, cap), 0, -1):
        if n % t == 0:
            if t % 8 == 0 or t == n:
                return t
            if best is None:
                best = t
    return best


# --------------------------- prologue: fused tf proj ------------------------
def _tf_proj_kernel(tf_ref, w_ref, b_ref, out_ref):
    # one matmul for [W_i | W_j | W_m] -> (tp, 2*C_Z + C_M)
    out_ref[...] = jnp.dot(tf_ref[...], w_ref[...],
                           preferred_element_type=jnp.float32) + b_ref[...]


# ------------------------------ pair kernel --------------------------------
def _pair_kernel(zi_ref, zj_ref, ids_i_ref, ids_j_ref, wr_ref, br_ref, out_ref):
    ti = zi_ref.shape[0]
    tj = zj_ref.shape[0]

    # id columns / rows (stacked order: pos, asym, entity, sym)
    pos_i = ids_i_ref[:, 0:1]          # (ti, 1) int32
    asym_i = ids_i_ref[:, 1:2]
    ent_i = ids_i_ref[:, 2:3]
    sym_i = ids_i_ref[:, 3:4]
    pos_j = ids_j_ref[0:1, :]          # (1, tj) int32
    asym_j = ids_j_ref[1:2, :]
    ent_j = ids_j_ref[2:3, :]
    sym_j = ids_j_ref[3:4, :]

    asym_same = asym_i == asym_j                                       # (ti, tj)
    ent_same = ent_i == ent_j                                          # (ti, tj)

    offset = pos_i - pos_j
    clipped = jnp.clip(offset + MAX_REL_IDX, 0, 2 * MAX_REL_IDX)
    final_offset = jnp.where(asym_same, clipped, 2 * MAX_REL_IDX + 1)  # < BP always

    rel_sym = sym_i - sym_j
    clipped_chain = jnp.clip(rel_sym + MAX_REL_CHAIN, 0, 2 * MAX_REL_CHAIN)
    final_chain = jnp.where(ent_same, clipped_chain, 2 * MAX_REL_CHAIN + 1)

    # Concatenated one-hot rel_feat [pos one-hot | entity_same | chain one-hot]
    # built without jnp.concatenate: the three feature groups occupy disjoint bin
    # ranges (pos in [0, BP), entity at BP, chain in [BP+1, NO_BINS)), so a single
    # boolean OR against a bin iota reproduces torch.cat([...], dim=-1) exactly.
    iota = lax.broadcasted_iota(jnp.int32, (ti, tj, NO_BINS), 2)
    feat = ((iota == final_offset[:, :, None])
            | ((iota == BP) & ent_same[:, :, None])
            | (iota == (BP + 1 + final_chain[:, :, None])))
    rel_feat = feat.astype(jnp.float32)                                # (ti, tj, NO_BINS)

    relpos = jnp.dot(rel_feat.reshape(ti * tj, NO_BINS), wr_ref[...],
                     preferred_element_type=jnp.float32) + br_ref[...]
    relpos = relpos.reshape(ti, tj, C_Z)

    out_ref[...] = zi_ref[...][:, None, :] + zj_ref[...][None, :, :] + relpos


# ------------------------------- msa kernel --------------------------------
def _msa_kernel(msa_ref, tfm_ref, wm_ref, bm_ref, out_ref):
    # tf_m is precomputed in the prologue; just one matmul + adds per block.
    out_ref[0] = (jnp.dot(msa_ref[0], wm_ref[...],
                          preferred_element_type=jnp.float32)
                  + bm_ref[...] + tfm_ref[...])


# -------------------------------- wrapper ----------------------------------
def input_embedder_multimer(batch, params):
    tf = batch["target_feat"].astype(jnp.float32)        # (N, tf_dim)
    msa = batch["msa_feat"].astype(jnp.float32)          # (S, N, msa_dim)
    n = tf.shape[0]
    s = msa.shape[0]

    # stacked ids: rows = (pos, asym, entity, sym)
    ids_row = jnp.stack([batch[k].astype(jnp.int32)
                         for k in ("residue_index", "asym_id", "entity_id", "sym_id")],
                        axis=0)                          # (4, N)  j-side (row form)
    ids_col = ids_row.T                                  # (N, 4)  i-side (column form)

    def t_w(p):          # torch Linear stores W as [out, in] -> pass [in, out]
        w, b = p
        return jnp.asarray(w, jnp.float32).T, jnp.asarray(b, jnp.float32).reshape(1, -1)

    wi, bi = t_w(params["tf_z_i"])
    wj, bj = t_w(params["tf_z_j"])
    wtm, btm = t_w(params["tf_m"])
    wm, bm = t_w(params["msa_m"])
    wr, br = t_w(params["relpos"])

    # ----- prologue: fused tf projections (one matmul, done ONCE) -----
    w_fused = jnp.concatenate([wi, wj, wtm], axis=1)     # (TF_DIM, F_DIM)
    b_fused = jnp.concatenate([bi, bj, btm], axis=1)     # (1, F_DIM)

    tp = _pick_tile(n, 512)
    fused = pl.pallas_call(
        _tf_proj_kernel,
        out_shape=jax.ShapeDtypeStruct((n, F_DIM), jnp.float32),
        grid=(n // tp,),
        in_specs=[
            pl.BlockSpec((tp, TF_DIM), lambda i: (i, 0)),
            pl.BlockSpec((TF_DIM, F_DIM), lambda i: (0, 0)),
            pl.BlockSpec((1, F_DIM), lambda i: (0, 0)),
        ],
        out_specs=pl.BlockSpec((tp, F_DIM), lambda i: (i, 0)),
        compiler_params=pltpu.CompilerParams(dimension_semantics=("parallel",)),
    )(tf, w_fused, b_fused)

    tf_emb_i = fused[:, :C_Z]                            # (N, C_Z)
    tf_emb_j = fused[:, C_Z:2 * C_Z]                     # (N, C_Z)
    tf_m = fused[:, 2 * C_Z:]                            # (N, C_M)

    # ----- pair embedding: 2D (i, j) grid, both axes parallel -----
    ti_tile = _pick_tile(n, 128)
    tj_tile = _pick_tile(n, 256)
    pair_emb = pl.pallas_call(
        _pair_kernel,
        out_shape=jax.ShapeDtypeStruct((n, n, C_Z), jnp.float32),
        grid=(n // ti_tile, n // tj_tile),
        in_specs=[
            pl.BlockSpec((ti_tile, C_Z), lambda i, j: (i, 0)),   # tf_emb_i tile
            pl.BlockSpec((tj_tile, C_Z), lambda i, j: (j, 0)),   # tf_emb_j tile
            pl.BlockSpec((ti_tile, 4), lambda i, j: (i, 0)),     # ids (column form)
            pl.BlockSpec((4, tj_tile), lambda i, j: (0, j)),     # ids (row form)
            pl.BlockSpec((NO_BINS, C_Z), lambda i, j: (0, 0)),   # W_relpos
            pl.BlockSpec((1, C_Z), lambda i, j: (0, 0)),         # b_relpos
        ],
        out_specs=pl.BlockSpec((ti_tile, tj_tile, C_Z), lambda i, j: (i, j, 0)),
        compiler_params=pltpu.CompilerParams(
            dimension_semantics=("parallel", "parallel"),
            vmem_limit_bytes=48 * 1024 * 1024),
    )(tf_emb_i, tf_emb_j, ids_col, ids_row, wr, br)

    # ----- msa embedding: large row blocks, tf_m precomputed -----
    tm_tile = _pick_tile(n, 512)
    msa_emb = pl.pallas_call(
        _msa_kernel,
        out_shape=jax.ShapeDtypeStruct((s, n, C_M), jnp.float32),
        grid=(s, n // tm_tile),
        in_specs=[
            pl.BlockSpec((1, tm_tile, MSA_DIM), lambda c, i: (c, i, 0)),
            pl.BlockSpec((tm_tile, C_M), lambda c, i: (i, 0)),
            pl.BlockSpec((MSA_DIM, C_M), lambda c, i: (0, 0)),
            pl.BlockSpec((1, C_M), lambda c, i: (0, 0)),
        ],
        out_specs=pl.BlockSpec((1, tm_tile, C_M), lambda c, i: (c, i, 0)),
        compiler_params=pltpu.CompilerParams(
            dimension_semantics=("parallel", "parallel")),
    )(msa, tf_m, wm, bm)

    return msa_emb, pair_emb


# ------------------------- deterministic parameters -------------------------
def init_params(key):
    def lin(k, d_in, d_out):
        kw, kb = jax.random.split(k)
        w = jax.random.normal(kw, (d_out, d_in), jnp.float32) * 0.05   # torch layout [out, in]
        b = jax.random.normal(kb, (d_out,), jnp.float32) * 0.05
        return w, b

    ks = jax.random.split(key, 5)
    return {
        "tf_z_i": lin(ks[0], TF_DIM, C_Z),
        "tf_z_j": lin(ks[1], TF_DIM, C_Z),
        "tf_m": lin(ks[2], TF_DIM, C_M),
        "msa_m": lin(ks[3], MSA_DIM, C_M),
        "relpos": lin(ks[4], NO_BINS, C_Z),
    }


# --------------------------- pure-JAX reference -----------------------------
def reference(batch, params):
    def lin(p, x):
        w, b = p
        return x @ w.T + b

    tf = batch["target_feat"]
    msa = batch["msa_feat"]
    pos = batch["residue_index"].astype(jnp.int32)
    asym = batch["asym_id"].astype(jnp.int32)
    ent = batch["entity_id"].astype(jnp.int32)
    sym = batch["sym_id"].astype(jnp.int32)

    tf_i = lin(params["tf_z_i"], tf)
    tf_j = lin(params["tf_z_j"], tf)
    pair = tf_i[:, None, :] + tf_j[None, :, :]

    asym_same = asym[:, None] == asym[None, :]
    offset = pos[:, None] - pos[None, :]
    clipped = jnp.clip(offset + MAX_REL_IDX, 0, 2 * MAX_REL_IDX)
    final_offset = jnp.where(asym_same, clipped, 2 * MAX_REL_IDX + 1)
    rel_pos = jax.nn.one_hot(final_offset, BP, dtype=jnp.float32)
    ent_same = ent[:, None] == ent[None, :]
    rel_sym = sym[:, None] - sym[None, :]
    clipped_chain = jnp.clip(rel_sym + MAX_REL_CHAIN, 0, 2 * MAX_REL_CHAIN)
    final_chain = jnp.where(ent_same, clipped_chain, 2 * MAX_REL_CHAIN + 1)
    rel_chain = jax.nn.one_hot(final_chain, 2 * MAX_REL_CHAIN + 2, dtype=jnp.float32)
    rel_feat = jnp.concatenate(
        [rel_pos, ent_same[..., None].astype(jnp.float32), rel_chain], axis=-1)
    pair = pair + lin(params["relpos"], rel_feat)

    tf_m = lin(params["tf_m"], tf)[None]
    msa_emb = lin(params["msa_m"], msa) + tf_m
    return msa_emb, pair


# ----------------------------------- main -----------------------------------
if __name__ == "__main__":
    key = jax.random.PRNGKey(0)
    k_tf, k_msa, k_par = jax.random.split(key, 3)

    half = N_RES // 2
    batch = {
        "target_feat": jax.random.normal(k_tf, (N_RES, TF_DIM), jnp.float32),
        "msa_feat": jax.random.normal(k_msa, (N_CLUST, N_RES, MSA_DIM), jnp.float32),
        # two chains of the same entity (homodimer-like), residues renumbered per chain
        "residue_index": jnp.concatenate([jnp.arange(half), jnp.arange(half)]).astype(jnp.int32),
        "asym_id": jnp.concatenate([jnp.zeros(half), jnp.ones(half)]).astype(jnp.int32),
        "entity_id": jnp.zeros((N_RES,), jnp.int32),
        "sym_id": jnp.concatenate([jnp.zeros(half), jnp.ones(half)]).astype(jnp.int32),
    }
    params = init_params(k_par)

    msa_emb, pair_emb = input_embedder_multimer(batch, params)
    jax.block_until_ready((msa_emb, pair_emb))

    msa_ref, pair_ref = reference(batch, params)
    assert msa_emb.shape == (N_CLUST, N_RES, C_M)
    assert pair_emb.shape == (N_RES, N_RES, C_Z)
    np.testing.assert_allclose(np.asarray(msa_emb), np.asarray(msa_ref), rtol=1e-5, atol=1e-5)
    np.testing.assert_allclose(np.asarray(pair_emb), np.asarray(pair_ref), rtol=1e-5, atol=1e-5)

    print("KERNEL_OK")
</pallas_src>

<mosaic_0001>
module attributes {stable_mosaic.version = 11 : i64} {
  func.func @_tf_proj_kernel(%arg0: i32, %arg1: memref<16x22xf32, #tpu.memory_space<vmem>>, %arg2: memref<22x88xf32, #tpu.memory_space<vmem>>, %arg3: memref<1x88xf32, #tpu.memory_space<vmem>>, %arg4: memref<16x88xf32, #tpu.memory_space<vmem>>) attributes {dimension_semantics = [#tpu.dimension_semantics<parallel>], iteration_bounds = array<i64: 1>, scalar_prefetch = 0 : i64, scratch_operands = 0 : i64, tpu.core_type = #tpu.core_type<tc>, window_params = [{transform_indices = @transform_0, window_bounds = array<i64: 16, 22>}, {pipeline_mode = #tpu.pipeline_mode<synchronous>, transform_indices = @transform_1, window_bounds = array<i64: 22, 88>}, {pipeline_mode = #tpu.pipeline_mode<synchronous>, transform_indices = @transform_2, window_bounds = array<i64: 1, 88>}, {transform_indices = @transform_3, window_bounds = array<i64: 16, 88>}]} {
    %c0 = arith.constant 0 : index
    %c0_0 = arith.constant 0 : index
    %0 = vector.load %arg1[%c0, %c0_0] : memref<16x22xf32, #tpu.memory_space<vmem>>, vector<16x22xf32>
    %c0_1 = arith.constant 0 : index
    %c0_2 = arith.constant 0 : index
    %1 = vector.load %arg2[%c0_1, %c0_2] : memref<22x88xf32, #tpu.memory_space<vmem>>, vector<22x88xf32>
    %cst = arith.constant dense<0.000000e+00> : vector<16x88xf32>
    %2 = tpu.matmul %0, %1, %cst {dimension_numbers = #tpu.dot_dimension_numbers<[1], [0], [0], [1], [0, 0, 1, 1], [], []>} : vector<16x22xf32>, vector<22x88xf32>, vector<16x88xf32> -> vector<16x88xf32>
    %c0_3 = arith.constant 0 : index
    %c0_4 = arith.constant 0 : index
    %3 = vector.load %arg3[%c0_3, %c0_4] : memref<1x88xf32, #tpu.memory_space<vmem>>, vector<1x88xf32>
    %4 = vector.broadcast %3 : vector<1x88xf32> to vector<16x88xf32>
    %5 = arith.addf %2, %4 : vector<16x88xf32>
    %c0_5 = arith.constant 0 : index
    %c0_6 = arith.constant 0 : index
    %6 = vector.load %arg4[%c0_5, %c0_6] : memref<16x88xf32, #tpu.memory_space<vmem>>, vector<16x88xf32>
    tpu.vector_store %arg4[%c0_5, %c0_6], %5 {strides = array<i32>} : memref<16x88xf32, #tpu.memory_space<vmem>>, vector<16x88xf32>,
    return
  }
  func.func @transform_0(%arg0: i32) -> (i32, i32) {
    %c0_i32 = arith.constant 0 : i32
    %c0_i32_0 = arith.constant 0 : i32
    return %arg0, %c0_i32 : i32, i32
  }
  func.func @transform_1(%arg0: i32) -> (i32, i32) {
    %c0_i32 = arith.constant 0 : i32
    %c0_i32_0 = arith.constant 0 : i32
    %c0_i32_1 = arith.constant 0 : i32
    return %c0_i32, %c0_i32_0 : i32, i32
  }
  func.func @transform_2(%arg0: i32) -> (i32, i32) {
    %c0_i32 = arith.constant 0 : i32
    %c0_i32_0 = arith.constant 0 : i32
    %c0_i32_1 = arith.constant 0 : i32
    return %c0_i32, %c0_i32_0 : i32, i32
  }
  func.func @transform_3(%arg0: i32) -> (i32, i32) {
    %c0_i32 = arith.constant 0 : i32
    %c0_i32_0 = arith.constant 0 : i32
    return %arg0, %c0_i32 : i32, i32
  }
}

</mosaic_0001>

<bundles_post_ra>
// kernel: tpu_custom_call.1
= control target key start
LH: loop header
LB: loop body
LE: loop exit
PB: predicated region body
PF: predicated region fallthrough
CT: control target
= control target key end

     0   :  { %8 = vsyncpa [#allocation3], 0  ;;  %s334_s0 = inlined_call_operand.hbm [shape: f32[16,22], index: 0, kind: input, shape index: {}]   ;;  %s335_s1 = inlined_call_operand.hbm [shape: f32[22,88], index: 1, kind: input, shape index: {}]   ;;  %s336_s2 = inlined_call_operand.vmem [shape: f32[1,88], index: 2, kind: input, shape index: {}]   ;;  %s337_s3 = inlined_call_operand.hbm [shape: f32[16,88], index: 3, kind: output, shape index: {}]  }
   0x1   :  { %9 = vsyncpa [#allocation6], 0 }
   0x2   :  { %10 = vsyncpa [#allocation4], 0  ;;  %s261_s12 = smov [#allocation2]   ;;  %s189_s16 = scalar_lea.hbm %s334_s0, 256 }
   0x3   :  { %s16_s13 = sshll.u32 %s261_s12, 4  ;;  %p190_p0 = scmp.ne.s32.totalorder %s334_s0, %s189_s16  ;;  %s17_s13 = int_to_ptr.vmem [resolvable:$true] %s16_s13 }
   0x4   :  { %p193_p1 = scmp.lt.u32.totalorder %s189_s16, %s334_s0 }
   0x6   :  { %p195_p2 = pnand %p193_p1, %p190_p0 }
   0x8   :  { %198 = shalt.err (!%p195_p2)
}
   0x9   :  { %s199_s21 = scalar_lea.vmem %s17_s13, 256  ;;  %p204_p4 = scmp.lt.s32.totalorder %s17_s13, %s17_s13 }
   0xa   :  { %p200_p3 = scmp.ne.s32.totalorder %s17_s13, %s199_s21  ;;  %p205_p5 = scmp.lt.s32.totalorder %s199_s21, %s199_s21 }
   0xc   :  { %p206_p6 = por %p205_p5, %p204_p4 }
   0xe   :  { %p207_p7 = pnand %p206_p6, %p200_p3 }
  0x10   :  { %210 = shalt.err (!%p207_p7)
}
  0x11   :  { %s262_s22 = smov 128   ;;  %s263_s23 = smov 8  }
  0x12   :  { %22 = dma.hbm_to_vmem [thread:$0]  %s334_s0, 256, %s17_s13, [#allocation3], %s262_s22, %s262_s22, %s263_s23  }
  0x13   :  { %s264_s26 = smov [#allocation5]   ;;  %s211_s30 = scalar_lea.hbm %s335_s1, 384 }
  0x14   :  { %s28_s27 = sshll.u32 %s264_s26, 4  ;;  %p212_p8 = scmp.ne.s32.totalorder %s335_s1, %s211_s30  ;;  %s29_s27 = int_to_ptr.vmem [resolvable:$true] %s28_s27 }
  0x15   :  { %p215_p9 = scmp.lt.u32.totalorder %s211_s30, %s335_s1 }
  0x17   :  { %p217_p10 = pnand %p215_p9, %p212_p8 }
  0x19   :  { %220 = shalt.err (!%p217_p10)
}
  0x1a   :  { %s221_s8 = scalar_lea.vmem %s29_s27, 384  ;;  %p226_p12 = scmp.lt.s32.totalorder %s29_s27, %s29_s27 }
  0x1b   :  { %p222_p11 = scmp.ne.s32.totalorder %s29_s27, %s221_s8  ;;  %p227_p13 = scmp.lt.s32.totalorder %s221_s8, %s221_s8 }
  0x1d   :  { %p228_p0 = por %p227_p13, %p226_p12 }
  0x1f   :  { %p229_p1 = pnand %p228_p0, %p222_p11 }
  0x21   :  { %232 = shalt.err (!%p229_p1)
}
  0x22   :  { %34 = dma.hbm_to_vmem [thread:$0]  %s335_s1, 384, %s29_s27, [#allocation6], %s262_s22, %s262_s22, %s263_s23  }
  0x23   :  { %255 = dma.done.wait [#allocation3], 256  }
  0x24   :  { %256 = vsyncadd [#allocation3], 4294967040 }
  0x25   :  { %257 = dma.done.wait [#allocation6], 384  }
  0x26   :  { %258 = vsyncadd [#allocation6], 4294966912  ;;  %vm55_vm0 = vcmask 179200   ;;  %v45_v0 = vld [vmem:[#allocation5] sm:$0xff]  ;;  %v46_v1 = vld [vmem:[#allocation5 + $0x8] sm:$0xff]  ;;  %vm62_vm1 = vcmask 1045504  }
  0x27   :  { %v180_v2 = vpack.c.bf16 %v46_v1, %v45_v0  ;;  %v43_v3 = vld [vmem:[#allocation2] sm:$0xff]  ;;  %v44_v5 = vld [vmem:[#allocation2 + $0x8] sm:$0xff]  ;;  %s265_s11 = smov [#allocation7]   ;;  %vm141_vm2 = vcmask 719872  }
  0x28   :  { %v47_v4 = vld [vmem:[#allocation5 + $0x10] sm:$0x3f]  ;;  %177 = vmatprep.mubr.msk.f32.mxu0 %vm55_vm0, %v43_v3  ;;  %s149_s12 = sshll.u32 %s265_s11, 4  ;;  %s150_s12 = int_to_ptr.vmem [resolvable:$true] %s149_s12 }
  0x29   :  { %181 = vmatprep.subr.bf16.mxu0 %v180_v2  ;;  %v162_v6 = vld [vmem:[%s336_s2] ss:$0 sm:$0xff]  ;;  %s233_s13 = scalar_lea.vmem %s150_s12, 256  ;;  %p238_p3 = scmp.lt.s32.totalorder %s150_s12, %s150_s12 }
  0x2a   :  { %183 = vmatpush3.bf16.msra.mxu0 %v180_v2  ;;  %p234_p2 = scmp.ne.s32.totalorder %s150_s12, %s233_s13  ;;  %p239_p4 = scmp.lt.s32.totalorder %s233_s13, %s233_s13 }
  0x2b   :  { %175 = vmatprep.subr.msk.mxu0 %vm62_vm1, %v47_v4 }
  0x2c   :  { %p240_p5 = por %p239_p4, %p238_p3 }
  0x2e   :  { %176 = vmatpush3.msk.msra.mxu0 %vm62_vm1, %v47_v4  ;;  %p241_p6 = pnand %p240_p5, %p234_p2 }
  0x2f   :  { %178 = vmatmul.mubr.msk.f32.vlgmr.msra.gmra.mrb[0].mxu0 %vm55_vm0, %v44_v5 }
 0x102   :  { %v179_v7 = vpop.f32.mrb[0].mxu0 }
 0x103   :  { %v138_v8 = vadd.f32 %v179_v7, %v162_v6  ;;  %v132_v9 = vpop.f32.mrb[1].mxu0 }
 0x104   :  { %v133_v10 = vadd.f32 %v162_v6, %v132_v9 }
 0x105   :  { %143 = vst.msk [vmem:[#allocation7 + $0x8] sm:$0xff] %vm141_vm2, %v138_v8 }
 0x106   :  { %142 = vst.msk [vmem:[#allocation7] sm:$0xff] %vm141_vm2, %v133_v10 }
 0x107   :  { %244 = shalt.err (!%p241_p6)
}
 0x108   :  { %s245_s2 = scalar_lea.hbm %s337_s3, 256 }
 0x109   :  { %p246_p7 = scmp.ne.s32.totalorder %s337_s3, %s245_s2  ;;  %p249_p8 = scmp.lt.u32.totalorder %s245_s2, %s337_s3 }
 0x10b   :  { %p251_p9 = pnand %p249_p8, %p246_p7 }
 0x10d   :  { %254 = shalt.err (!%p251_p9)
}
 0x10e   :  { %155 = dma.vmem_to_hbm [thread:$0]  %s150_s12, 256, %s337_s3, [#allocation4], %s262_s22, %s262_s22, %s263_s23  }
 0x10f   :  { %259 = dma.done.wait [#allocation4], 256  }
 0x110   :  { %260 = vsyncadd [#allocation4], 4294967040 }
 0x111   :  { %159 = vsyncpa [#allocation3], 1 }
 0x112   :  { %160 = vsyncpa [#allocation6], 1 }
 0x113   :  { %161 = vsyncpa [#allocation4], 1 }

</bundles_post_ra>
